<compile_context>
chip_gen: v5e
topology: v5e:2x2
jax: 0.10.0
libtpu: 0.0.40
codegen_flags: <defaults>
</compile_context>

<pallas_src>
import jax
import jax.numpy as jnp
from jax.experimental import pallas as pl
from jax.experimental.pallas import tpu as pltpu


_LANE = 128
_SUBLANE = 8
_VMEM_LIMIT = 32 * 1024 * 1024          # safe scoped limit on v5e / v6e / v7x
_VMEM_TILE_BUDGET = 20 * 1024 * 1024    # double-buffered x/out tiles must fit here
_TARGET_STEP_BYTES = 2 * 1024 * 1024    # aim for ~2 MB of HBM traffic per grid step


def _proj_kernel(x_ref, w_ref, b_ref, o_ref):
    # x_ref: (NB, C_in, THW) compute dtype (bf16) — native NCHW layout, no transpose
    # w_ref: (C_out_pad, C_in) compute dtype     — same block every grid step
    # b_ref: (C_out_pad, 1) f32                  — bias column, broadcast over lanes
    # o_ref: (NB, C_out_pad, THW)                — lane-dense (THW % 128 == 0) output
    w = w_ref[...]
    b = b_ref[...]
    nb = x_ref.shape[0]
    for i in range(nb):  # static unroll over the small batch block
        acc = jnp.dot(w, x_ref[i], preferred_element_type=jnp.float32)
        o_ref[i] = (acc + b).astype(o_ref.dtype)


def _round_up(x, m):
    return ((x + m - 1) // m) * m


def _largest_aligned_divisor(total, unit, cap):
    """Largest d <= cap with d % unit == 0 and total % d == 0 (total % unit == 0)."""
    cap = max(unit, (min(cap, total) // unit) * unit)
    for d in range(cap, unit - 1, -unit):
        if total % d == 0:
            return d
    return unit


def _pick_batch_block(n, per_image_bytes, const_bytes, budget, target):
    """Smallest divisor of n whose step traffic reaches `target`, else the largest
    divisor whose double-buffered footprint still fits `budget`."""
    best = 1
    for nb in range(1, n + 1):
        if n % nb:
            continue
        if 2 * nb * per_image_bytes + const_bytes > budget:
            break
        best = nb
        if nb * per_image_bytes >= target:
            break
    return best


def conv1x1_nchw(x_nchw, weight, bias, *, compute_dtype=jnp.bfloat16,
                 out_dtype=None, max_hw_tile=32768):
    """Equivalent of nn.Conv2d(c_in, c_out, 1, bias=True) / TESTAM's start_linear
    applied directly to an NCHW tensor (no wrapper transposes).

    x_nchw: (N, C_in, H, W)   weight: (C_out, C_in)   bias: (C_out,)
    returns (N, C_out, H, W) in `out_dtype` (default: x's dtype).
    """
    N, C_in, H, W = x_nchw.shape
    C_out = weight.shape[0]
    HW = H * W
    out_dtype = x_nchw.dtype if out_dtype is None else out_dtype

    isz_in = jnp.dtype(compute_dtype).itemsize
    isz_out = jnp.dtype(out_dtype).itemsize

    # --- wrapper-side layout prep: contiguous reshapes + trailing-dim pads only ---
    HW_pad = _round_up(HW, _LANE)            # lane-dense, 128-aligned output stores
    C_out_pad = _round_up(C_out, _SUBLANE)   # sublane-aligned output rows

    x3 = x_nchw.reshape(N, C_in, HW).astype(compute_dtype)
    if HW_pad != HW:
        x3 = jnp.pad(x3, ((0, 0), (0, 0), (0, HW_pad - HW)))
    w = weight.astype(compute_dtype)
    b = bias.astype(jnp.float32)
    if C_out_pad != C_out:
        w = jnp.pad(w, ((0, C_out_pad - C_out), (0, 0)))
        b = jnp.pad(b, (0, C_out_pad - C_out))
    b_col = b.reshape(C_out_pad, 1)

    # --- tile selection: big, lane-aligned steps bounded by the VMEM budget ---
    row_bytes = C_in * isz_in + C_out_pad * isz_out          # bytes per spatial element
    max_thw_by_vmem = max(_LANE, _VMEM_TILE_BUDGET // (2 * row_bytes))
    thw = _largest_aligned_divisor(HW_pad, _LANE, min(max_hw_tile, max_thw_by_vmem))

    per_image_bytes = row_bytes * thw
    const_bytes = C_out_pad * C_in * isz_in + C_out_pad * 4  # weight + bias (tiny)
    nb = _pick_batch_block(N, per_image_bytes, const_bytes,
                           _VMEM_TILE_BUDGET, _TARGET_STEP_BYTES)

    # v7x has 2 TensorCores sharded via "parallel" axes: keep >= 2 grid steps
    # when the problem allows it (on v5e/v6e the grid is just a sequential loop).
    if (N // nb) * (HW_pad // thw) < 2:
        if nb > 1:
            nb = max(d for d in range(1, nb) if N % d == 0)
        elif HW_pad > _LANE:
            thw = _largest_aligned_divisor(HW_pad, _LANE, thw // 2)

    grid = (N // nb, HW_pad // thw)

    out3 = pl.pallas_call(
        _proj_kernel,
        out_shape=jax.ShapeDtypeStruct((N, C_out_pad, HW_pad), out_dtype),
        grid_spec=pltpu.PrefetchScalarGridSpec(
            num_scalar_prefetch=0,
            grid=grid,
            in_specs=[
                pl.BlockSpec((nb, C_in, thw), lambda n, t: (n, 0, t)),
                # grid-invariant weight / bias blocks (tiny; extra buffer negligible)
                pl.BlockSpec((C_out_pad, C_in), lambda n, t: (0, 0)),
                pl.BlockSpec((C_out_pad, 1), lambda n, t: (0, 0)),
            ],
            out_specs=pl.BlockSpec((nb, C_out_pad, thw), lambda n, t: (n, 0, t)),
        ),
        compiler_params=pltpu.CompilerParams(
            dimension_semantics=("parallel", "parallel"),
            vmem_limit_bytes=_VMEM_LIMIT,
        ),
    )(x3, w, b_col)

    # Strip the channel / spatial padding (cheap slice) and restore (N, C_out, H, W).
    out3 = out3[:, :C_out, :HW]
    return out3.reshape(N, C_out, H, W)


if __name__ == "__main__":
    key = jax.random.PRNGKey(0)
    k_x, k_w, k_b = jax.random.split(key, 3)

    # Small shapes consistent with TESTAM's start_linear on a (B, in_dim, N, T) input:
    # batch=2, in_dim=4 channels, 16 nodes x 16 timesteps, projected channels = 8.
    N, C_in, C_out, Hs, Ws = 2, 4, 8, 16, 16

    x = jax.random.normal(k_x, (N, C_in, Hs, Ws), dtype=jnp.float32)

    # Deterministic param init (mimics PyTorch uniform(-1/sqrt(fan_in), ...)).
    bound = 1.0 / (C_in ** 0.5)
    weight = jax.random.uniform(k_w, (C_out, C_in), minval=-bound, maxval=bound,
                                dtype=jnp.float32)
    bias = jax.random.uniform(k_b, (C_out,), minval=-bound, maxval=bound,
                              dtype=jnp.float32)

    y = conv1x1_nchw(x, weight, bias)   # bf16 reads, f32 accumulation, f32 output
    y = jax.block_until_ready(y)

    # Reference uses the same bf16-rounded operands so the f32-accumulated results
    # match tightly (products of bf16 values are exact in f32).
    x_q = x.astype(jnp.bfloat16).astype(jnp.float32)
    w_q = weight.astype(jnp.bfloat16).astype(jnp.float32)
    y_ref = jnp.einsum("nchw,oc->nohw", x_q, w_q,
                       precision=jax.lax.Precision.HIGHEST) + bias[None, :, None, None]
    assert y.shape == (N, C_out, Hs, Ws)
    assert jnp.allclose(y, y_ref, atol=1e-4, rtol=1e-4), float(jnp.max(jnp.abs(y - y_ref)))

    print("KERNEL_OK")
</pallas_src>

<mosaic_0001>
module attributes {stable_mosaic.version = 11 : i64} {
  func.func @_proj_kernel(%arg0: i32, %arg1: i32, %arg2: memref<1x4x256xbf16, #tpu.memory_space<vmem>>, %arg3: memref<8x4xbf16, #tpu.memory_space<vmem>>, %arg4: memref<8x1xf32, #tpu.memory_space<vmem>>, %arg5: memref<1x8x256xf32, #tpu.memory_space<vmem>>) attributes {dimension_semantics = [#tpu.dimension_semantics<parallel>, #tpu.dimension_semantics<parallel>], iteration_bounds = array<i64: 2, 1>, scalar_prefetch = 0 : i64, scratch_operands = 0 : i64, tpu.core_type = #tpu.core_type<tc>, window_params = [{transform_indices = @transform_0, window_bounds = array<i64: 1, 4, 256>}, {pipeline_mode = #tpu.pipeline_mode<synchronous>, transform_indices = @transform_1, window_bounds = array<i64: 8, 4>}, {pipeline_mode = #tpu.pipeline_mode<synchronous>, transform_indices = @transform_2, window_bounds = array<i64: 8, 1>}, {transform_indices = @transform_3, window_bounds = array<i64: 1, 8, 256>}]} {
    %c0 = arith.constant 0 : index
    %c0_0 = arith.constant 0 : index
    %0 = vector.load %arg3[%c0, %c0_0] : memref<8x4xbf16, #tpu.memory_space<vmem>>, vector<8x4xbf16>
    %c0_1 = arith.constant 0 : index
    %c0_2 = arith.constant 0 : index
    %1 = vector.load %arg4[%c0_1, %c0_2] : memref<8x1xf32, #tpu.memory_space<vmem>>, vector<8x1xf32>
    %c0_3 = arith.constant 0 : index
    %c0_4 = arith.constant 0 : index
    %c0_5 = arith.constant 0 : index
    %2 = vector.load %arg2[%c0_3, %c0_4, %c0_5] : memref<1x4x256xbf16, #tpu.memory_space<vmem>>, vector<1x4x256xbf16>
    %3 = vector.shape_cast %2 : vector<1x4x256xbf16> to vector<4x256xbf16>
    %cst = arith.constant dense<0.000000e+00> : vector<8x256xf32>
    %4 = tpu.matmul %0, %3, %cst {dimension_numbers = #tpu.dot_dimension_numbers<[1], [0], [0], [1], [0, 0, 1, 1], [], []>} : vector<8x4xbf16>, vector<4x256xbf16>, vector<8x256xf32> -> vector<8x256xf32>
    %5 = vector.broadcast %1 : vector<8x1xf32> to vector<8x256xf32>
    %6 = arith.addf %4, %5 : vector<8x256xf32>
    %c0_6 = arith.constant 0 : index
    %c0_7 = arith.constant 0 : index
    %c0_8 = arith.constant 0 : index
    %7 = vector.load %arg5[%c0_6, %c0_7, %c0_8] : memref<1x8x256xf32, #tpu.memory_space<vmem>>, vector<1x8x256xf32>
    %8 = vector.shape_cast %7 : vector<1x8x256xf32> to vector<8x256xf32>
    %9 = vector.shape_cast %6 : vector<8x256xf32> to vector<1x8x256xf32>
    tpu.vector_store %arg5[%c0_6, %c0_7, %c0_8], %9 {strides = array<i32>} : memref<1x8x256xf32, #tpu.memory_space<vmem>>, vector<1x8x256xf32>,
    return
  }
  func.func @transform_0(%arg0: i32, %arg1: i32) -> (i32, i32, i32) {
    %c0_i32 = arith.constant 0 : i32
    %c0_i32_0 = arith.constant 0 : i32
    return %arg0, %c0_i32, %arg1 : i32, i32, i32
  }
  func.func @transform_1(%arg0: i32, %arg1: i32) -> (i32, i32) {
    %c0_i32 = arith.constant 0 : i32
    %c0_i32_0 = arith.constant 0 : i32
    %c0_i32_1 = arith.constant 0 : i32
    return %c0_i32, %c0_i32_0 : i32, i32
  }
  func.func @transform_2(%arg0: i32, %arg1: i32) -> (i32, i32) {
    %c0_i32 = arith.constant 0 : i32
    %c0_i32_0 = arith.constant 0 : i32
    %c0_i32_1 = arith.constant 0 : i32
    return %c0_i32, %c0_i32_0 : i32, i32
  }
  func.func @transform_3(%arg0: i32, %arg1: i32) -> (i32, i32, i32) {
    %c0_i32 = arith.constant 0 : i32
    %c0_i32_0 = arith.constant 0 : i32
    return %arg0, %c0_i32, %arg1 : i32, i32, i32
  }
}

</mosaic_0001>

<bundles_post_ra>
// kernel: tpu_custom_call.1
= control target key start
LH: loop header
LB: loop body
LE: loop exit
PB: predicated region body
PF: predicated region fallthrough
CT: control target
= control target key end

     0   :  { %8 = vsyncpa [#allocation3], 0  ;;  %s623_s0 = inlined_call_operand.vmem [shape: bf16[2,4,256], index: 0, kind: input, shape index: {}]   ;;  %s624_s1 = inlined_call_operand.vmem [shape: bf16[8,4], index: 1, kind: input, shape index: {}]   ;;  %s625_s2 = inlined_call_operand.vmem [shape: f32[8,1], index: 2, kind: input, shape index: {}]   ;;  %s626_s3 = inlined_call_operand.hbm [shape: f32[2,8,256], index: 3, kind: output, shape index: {}]  }
   0x1   :  { %10 = vsyncpa [#allocation3 + $0x1], 0  ;;  %s520_s12 = smov 0   ;;  %s522_s13 = smov 0  }
   0x2   :  { %s524_s14 = smov 0   ;;  %s526_s15 = smov 0  }
   0x3   :  { %s528_s16 = smov 0   ;;  %s530_s17 = smov 0  }
   0x4 LB: > { %s345_s18 = sadd.s32 4294967295, %s497_s17   ;;  %s346_s19 = sadd.s32 4294967294, %s497_s17   ;;  %s497_s17 = sphi %s530_s17, %s16_s17   ;;  %s493_s16 = sphi %s528_s16, %s633_s16   ;;  %s489_s15 = sphi %s526_s15, %s632_s15   ;;  %s485_s14 = sphi %s524_s14, %s631_s14   ;;  %s481_s13 = sphi %s522_s13, %s630_s13   ;;  %s477_s12 = sphi %s520_s12, %s629_s12  }
   0x5   : > { %s28_s20 = sadd.s32 1, %s493_s16  ;;  %s107_s21 = sadd.s32 1, %s485_s14 }
   0x6   : > { %p30_p0 = scmp.ge.s32.totalorder %s28_s20, 2  ;;  %p117_p1 = scmp.ne.s32.totalorder %s485_s14, %s481_s13 }
   0x7   : > { %p118_p2 = scmp.eq.s32.totalorder %s345_s18, 1  ;;  %p123_p3 = scmp.ne.s32.totalorder %s481_s13, %s477_s12 }
   0x8   : > { %s635_s20 = smov (%p30_p0, %s28_s20), 0  ;;  %p124_p5 = scmp.eq.s32.totalorder %s346_s19, 1 }
   0x9   : > { %p560_p4 = por %p118_p2, %p117_p1  ;;  %s102_s23 = ssub.s32 %s493_s16, %s635_s20 }
   0xa   : > { %p349_p6 = scmp.ge.s32.totalorder %s497_s17, 1  ;;  %p105_p7 = scmp.eq.s32.totalorder %s102_s23, 0 }
   0xb   : > { %p567_p8 = por %p124_p5, %p123_p3  ;;  %p161_p9 = scmp.lt.s32.totalorder %s497_s17, 3 }
   0xc   : > { %s573_s25 = scalar_select %p105_p7, %s485_s14, %s107_s21  }
   0xd   : > { %p162_p10 = pnand %p349_p6, %p161_p9 }
   0xe   : > { %p190_p11 = scmp.lt.s32.totalorder (!%p162_p10), %s489_s15, 1  ;;  %s186_s8 = sand.u32 (!%p162_p10), 1, %s481_s13  }
   0xf   : > { %165 = sbr.rel (%p162_p10) target bundleno = 171 (0xab), region = 32  ;;  %s361_s9 = sshll.u32 (!%p162_p10), %s489_s15, 4 }
  0x10   : > { %s350_s10 = sshll.u32 (!%p162_p10), %s186_s8, 4  ;;  %s264_s19 = scalar_lea.hbm (!%p162_p10), %s626_s3, %s361_s9 }
  0x11   : > { %s188_s21 = scalar_lea.vmem (!%p162_p10), [#allocation2], %s350_s10  ;;  %s268_s26 = sshll.u32 (!%p162_p10), %s264_s19, 4  ;;  %s269_s26 = int_to_ptr.hbm [resolvable:$true] %s268_s26 }
  0x12   : > { %s266_s23 = sshll.u32 (!%p162_p10), %s188_s21, 4  ;;  %s251_s27 = scalar_lea.sflag (!%p162_p10), [#allocation3], %s186_s8  ;;  %s267_s23 = int_to_ptr.vmem [resolvable:$true] %s266_s23 }
  0x13   : > { %s439_s4 = scalar_lea.hbm (!%p162_p10), %s626_s3, 32 }
  0x14   : > { %v499_v0 = vmov 0   ;;  %v202_v1 = vld [vmem:[%s625_s2] sm:$0xff]  ;;  %s191_s28 = scalar_select %p190_p11, %s489_s15, 1  ;;  %vm217_vm0 = vcmask 1041408   ;;  %vm213_vm1 = vcmask 31744  }
  0x15   : > { %418 = vset.pattern.permute.xlu0 %v499_v0  ;;  %v201_v7 = vld [vmem:[%s624_s1] sm:$0xf]  ;;  %s433_s15 = sshra.s32 %s269_s26, 4  ;;  %s434_s15 = int_to_ptr.hbm [resolvable:$true] %s433_s15 }
  0x16   : > { %206 = vperm.xlu0 %418, %v202_v1   ;;  %s360_s29 = sshll.u32 %s191_s28, 2  ;;  %s435_s28 = scalar_lea.hbm %s434_s15, 16 }
  0x17   : > { %s197_s5 = scalar_lea.vmem %s623_s0, %s360_s29  ;;  %p436_p12 = scmp.ne.s32.totalorder %s434_s15, %s435_s28 }
  0x18   : > { %v203_v2 = vld [vmem:[%s197_s5] sm:$0xf]  ;;  %p440_p1 = scmp.lt.s32.totalorder %s434_s15, %s626_s3  ;;  %p441_p2 = scmp.lt.s32.totalorder %s439_s4, %s435_s28 }
  0x19   : > { %210 = vst [vmem:[#allocation1] ss:$4 sm:$0xff] %v203_v2  ;;  %p437_p13 = pnand %p436_p12, %p560_p4 }
  0x1a   : > { %p442_p3 = por %p441_p2, %p440_p1 }
  0x1b   : > { %p438_p0 = pneg %p437_p13 }
  0x1d   : > { %p443_p5 = pnand %p442_p3, %p438_p0 }
  0x20   : > { %v211_v3 = vld.sshfl [vmem:[#allocation1] sm:$0xff pattern:$0x73625140]  ;;  %v212_v4 = vld.sshfl [vmem:[#allocation1 + $0x8] sm:$0xff pattern:$0x73625140] }
  0x21   : > { %v218_v5 = vsel %vm217_vm0, %v211_v3, 0  ;;  %v220_v6 = vsel %vm217_vm0, %v212_v4, 0 }
  0x22   : > { %229 = vmatpush.bf16.msra.mxu0 %v218_v5  ;;  %242 = vmatpush.bf16.msra.mxu1 %v220_v6 }
  0x25   : > { %353 = vmatmul.msk.bf16.vlgmr.msra.gmra.mxu0 %vm213_vm1, %v201_v7  ;;  %354 = vmatmul.msk.bf16.vlgmr.msra.gmra.mxu1 %vm213_vm1, %v201_v7 }
  0x88   : > { %v207_v8 = vpop.permute.xlu0 %206 }
  0xa2   : > { %v231_v9 = vpop.f32.mrf.mxu0  ;;  %v244_v10 = vpop.f32.mrf.mxu1 }
  0xa3   : > { %v232_v11 = vadd.f32 %v231_v9, %v207_v8  ;;  %v245_v12 = vadd.f32 %v244_v10, %v207_v8 }
  0xa5   : > { %248 = vst [vmem:[%s188_s21] sm:$0xff] %v232_v11 }
  0xa6   : > { %249 = vst [vmem:[%s188_s21 + $0x8] sm:$0xff] %v245_v12 }
  0xa7   : > { %446 = shalt.err (!%p443_p5)
}
  0xa8   : > { %362 = dma.vmem_to_hbm [thread:$0]  (%p560_p4), %s267_s23, 256, %s269_s26, %s251_s27  }
  0xaa   : > { %v233_v13 = vpop.f32.mrf.mxu0  ;;  %v246_v14 = vpop.f32.mrf.mxu1 }
  0xab PF: > { %p368_p6 = scmp.ge.s32.totalorder %s497_s17, 2  ;;  %s280_s7 = sand.u32 1, %s477_s12  }
  0xac   : > { %s281_s8 = scalar_lea.sflag [#allocation3], %s280_s7 }
  0xad   : > { %p365_p7 = pnand %p368_p6, %p567_p8 }
  0xaf   : > { %p366_p9 = pneg %p365_p7 }
  0xb1   : > { %472 = dma.done.wait (%p366_p9), %s281_s8, 256  }
  0xb2   : > { %474 = vsyncadd (%p366_p9), %s281_s8, 4294967040  ;;  %s16_s17 = sadd.s32 1, %s497_s17   ;;  %s629_s12 = smov %s481_s13 }
  0xb3   : > { %p13_p10 = scmp.ge.s32.totalorder %s16_s17, 4   ;;  %s630_s13 = smov %s485_s14 }
  0xb4   : > { %s631_s14 = smov %s573_s25  ;;  %s632_s15 = smov %s493_s16 }
  0xb5   : > { %s633_s16 = smov %s635_s20  ;;  %15 = sbr.rel (!%p13_p10) target bundleno = 4 (0x4), region = 67 }
  0xba   :  { %287 = vsyncpa [#allocation3], 1 }
  0xbb   :  { %289 = vsyncpa [#allocation3 + $0x1], 1 }

</bundles_post_ra>
